<compile_context>
chip_gen: v7x
topology: tpu7x:2x2x1
jax: 0.10.0
libtpu: 0.0.40
codegen_flags: <defaults>
</compile_context>

<pallas_src>
import jax
import jax.numpy as jnp
from jax.experimental import pallas as pl
from jax.experimental.pallas import tpu as pltpu


def gate_kernel(x_ref, w_ref, b_ref, o_ref):
    # logits^T: [E, TB] = W [E, D_in] (.) x_tile [TB, D_in], contracting D_in.
    # "NT" dot_general form keeps the MXU contraction explicit without
    # materializing a transpose of x.
    logits = jax.lax.dot_general(
        w_ref[...], x_ref[...],
        dimension_numbers=(((1,), (1,)), ((), ())),
        preferred_element_type=jnp.float32,
    ) + b_ref[...]                                   # bias [E, 1] lane-broadcast

    # Numerically-stable softmax over the expert axis (sublane axis here,
    # == PyTorch dim=1 of the [B, E] logits).  Exact divide for accuracy.
    m = jnp.max(logits, axis=0, keepdims=True)       # [1, TB]
    e = jnp.exp(logits - m)
    denom = jnp.sum(e, axis=0, keepdims=True)        # [1, TB]
    o_ref[...] = (e / denom).astype(o_ref.dtype)


def gate_forward(x, w, b, *, tb=1024):
    """x: [B, D_in]; w: [E, D_in] (PyTorch nn.Linear layout); b: [E] -> [B, E]."""
    B, D_in = x.shape
    E = w.shape[0]

    # Batch tile = lane dimension inside the kernel.  TB=1024 keeps the whole
    # softmax working set (~32 vregs) in registers while staying near the HBM
    # roofline; per-step VMEM (double-buffered x/out tiles plus resident W and
    # bias) is well under 1 MiB, far inside the default scoped-VMEM limit.
    if B >= tb:
        TB = tb
        B_pad = pl.cdiv(B, TB) * TB
    else:
        TB = B          # single full-extent block (satisfies the (8,128) rule)
        B_pad = B
    if B_pad != B:
        # Padded rows just compute softmax(bias) and are sliced off below.
        x = jnp.pad(x, ((0, B_pad - B), (0, 0)))

    out_t = pl.pallas_call(
        gate_kernel,
        out_shape=jax.ShapeDtypeStruct((E, B_pad), jnp.float32),
        grid=(B_pad // TB,),
        in_specs=[
            pl.BlockSpec((TB, D_in), lambda i: (i, 0)),  # x: tiled, double-buffered
            pl.BlockSpec((E, D_in), lambda i: (0, 0)),   # W: resident across steps
            pl.BlockSpec((E, 1), lambda i: (0, 0)),      # bias: resident across steps
        ],
        out_specs=pl.BlockSpec((E, TB), lambda i: (0, i)),
        compiler_params=pltpu.CompilerParams(
            # Batch tiles are independent -> allow megacore sharding on v7x.
            dimension_semantics=("parallel",),
        ),
        cost_estimate=pl.CostEstimate(
            flops=2 * B_pad * D_in * E,
            transcendentals=B_pad * E,
            bytes_accessed=4 * (B_pad * D_in + E * D_in + E + E * B_pad),
        ),
    )(x, w, b.reshape(E, 1))

    # [E, B_pad] -> [B, E]: wrapper-side layout plumbing only.
    # TODO(synk): in a full MMoE model, fuse this gate into the downstream
    # expert-mixing kernel instead of emitting a standalone [B, E] array.
    return out_t.T[:B]


if __name__ == "__main__":
    # Small shapes consistent with the module: Gate(input_size=32, expert_size=8)
    B, D_in, E = 8, 32, 8

    key = jax.random.PRNGKey(0)
    kx, kw, kb = jax.random.split(key, 3)

    # Deterministic parameter init mimicking nn.Linear (uniform +-1/sqrt(fan_in));
    # weight kept in PyTorch's native [E, D_in] layout.
    bound = 1.0 / (D_in ** 0.5)
    w = jax.random.uniform(kw, (E, D_in), jnp.float32, -bound, bound)
    b = jax.random.uniform(kb, (E,), jnp.float32, -bound, bound)
    x = jax.random.normal(kx, (B, D_in), jnp.float32)

    y = jax.jit(gate_forward)(x, w, b)
    jax.block_until_ready(y)

    # Reference check (plain JAX): Linear + softmax over dim=1.
    ref = jax.nn.softmax(x @ w.T + b, axis=1)
    assert y.shape == (B, E)
    assert jnp.allclose(y, ref, atol=1e-5, rtol=1e-5), "mismatch vs reference"
    assert jnp.allclose(jnp.sum(y, axis=1), jnp.ones((B,)), atol=1e-5)

    print("KERNEL_OK")
</pallas_src>

<mosaic_0001>
module attributes {stable_mosaic.version = 11 : i64} {
  func.func @gate_kernel(%arg0: i32, %arg1: memref<8x32xf32, #tpu.memory_space<vmem>>, %arg2: memref<8x32xf32, #tpu.memory_space<vmem>>, %arg3: memref<8x1xf32, #tpu.memory_space<vmem>>, %arg4: memref<8x8xf32, #tpu.memory_space<vmem>>) attributes {dimension_semantics = [#tpu.dimension_semantics<parallel>], iteration_bounds = array<i64: 1>, scalar_prefetch = 0 : i64, scratch_operands = 0 : i64, tpu.core_type = #tpu.core_type<tc>, window_params = [{transform_indices = @transform_0, window_bounds = array<i64: 8, 32>}, {pipeline_mode = #tpu.pipeline_mode<synchronous>, transform_indices = @transform_1, window_bounds = array<i64: 8, 32>}, {pipeline_mode = #tpu.pipeline_mode<synchronous>, transform_indices = @transform_2, window_bounds = array<i64: 8, 1>}, {transform_indices = @transform_3, window_bounds = array<i64: 8, 8>}]} {
    %c0 = arith.constant 0 : index
    %c0_0 = arith.constant 0 : index
    %0 = vector.load %arg2[%c0, %c0_0] : memref<8x32xf32, #tpu.memory_space<vmem>>, vector<8x32xf32>
    %c0_1 = arith.constant 0 : index
    %c0_2 = arith.constant 0 : index
    %1 = vector.load %arg1[%c0_1, %c0_2] : memref<8x32xf32, #tpu.memory_space<vmem>>, vector<8x32xf32>
    %cst = arith.constant dense<0.000000e+00> : vector<8x8xf32>
    %2 = tpu.matmul %0, %1, %cst {dimension_numbers = #tpu.dot_dimension_numbers<[1], [1], [0], [0], [0, 0, 1, 0], [], []>} : vector<8x32xf32>, vector<8x32xf32>, vector<8x8xf32> -> vector<8x8xf32>
    %c0_3 = arith.constant 0 : index
    %c0_4 = arith.constant 0 : index
    %3 = vector.load %arg3[%c0_3, %c0_4] : memref<8x1xf32, #tpu.memory_space<vmem>>, vector<8x1xf32>
    %4 = vector.broadcast %3 : vector<8x1xf32> to vector<8x8xf32>
    %5 = arith.addf %2, %4 : vector<8x8xf32>
    %cst_5 = arith.constant dense<0xFF800000> : vector<8xf32>
    %6 = vector.multi_reduction <maximumf>, %5, %cst_5 [0] : vector<8x8xf32> to vector<8xf32>
    %7 = vector.shape_cast %6 : vector<8xf32> to vector<1x8xf32>
    %8 = vector.broadcast %7 : vector<1x8xf32> to vector<8x8xf32>
    %9 = arith.subf %5, %8 : vector<8x8xf32>
    %10 = math.exp %9 : vector<8x8xf32>
    %cst_6 = arith.constant dense<0.000000e+00> : vector<8xf32>
    %11 = vector.multi_reduction <add>, %10, %cst_6 [0] : vector<8x8xf32> to vector<8xf32>
    %12 = vector.shape_cast %11 : vector<8xf32> to vector<1x8xf32>
    %13 = vector.broadcast %12 : vector<1x8xf32> to vector<8x8xf32>
    %14 = arith.divf %10, %13 : vector<8x8xf32>
    %c0_7 = arith.constant 0 : index
    %c0_8 = arith.constant 0 : index
    %15 = vector.load %arg4[%c0_7, %c0_8] : memref<8x8xf32, #tpu.memory_space<vmem>>, vector<8x8xf32>
    tpu.vector_store %arg4[%c0_7, %c0_8], %14 {strides = array<i32>} : memref<8x8xf32, #tpu.memory_space<vmem>>, vector<8x8xf32>,
    return
  }
  func.func @transform_0(%arg0: i32) -> (i32, i32) {
    %c0_i32 = arith.constant 0 : i32
    %c0_i32_0 = arith.constant 0 : i32
    return %arg0, %c0_i32 : i32, i32
  }
  func.func @transform_1(%arg0: i32) -> (i32, i32) {
    %c0_i32 = arith.constant 0 : i32
    %c0_i32_0 = arith.constant 0 : i32
    %c0_i32_1 = arith.constant 0 : i32
    return %c0_i32, %c0_i32_0 : i32, i32
  }
  func.func @transform_2(%arg0: i32) -> (i32, i32) {
    %c0_i32 = arith.constant 0 : i32
    %c0_i32_0 = arith.constant 0 : i32
    %c0_i32_1 = arith.constant 0 : i32
    return %c0_i32, %c0_i32_0 : i32, i32
  }
  func.func @transform_3(%arg0: i32) -> (i32, i32) {
    %c0_i32 = arith.constant 0 : i32
    %c0_i32_0 = arith.constant 0 : i32
    return %c0_i32, %arg0 : i32, i32
  }
}

</mosaic_0001>

<bundles_post_ra>
// kernel: gate_forward.1
= control target key start
LH: loop header
LB: loop body
LE: loop exit
PB: predicated region body
PF: predicated region fallthrough
CT: control target
= control target key end

     0   :  { %vm22_vm0 = vcmask 261120   ;;  %v141_v0 = vmov 0.0   ;;  %vm142_vm1 = vmmov 0   ;;  %v143_v4 = vmov 0   ;;  %s179_s0 = inlined_call_operand.vmem [shape: f32[8,32], index: 0, kind: input, shape index: {}]   ;;  %s180_s1 = inlined_call_operand.vmem [shape: f32[8,32], index: 1, kind: input, shape index: {}]   ;;  %s181_s2 = inlined_call_operand.vmem [shape: f32[8,1], index: 2, kind: input, shape index: {}]   ;;  %s182_s3 = inlined_call_operand.vmem [shape: f32[8,8], index: 3, kind: output, shape index: {}]  }
   0x1   :  { %128 = vmatprep.subr.mxu0 %v141_v0  ;;  %v15_v1 = vld [vmem:[%s179_s0] sm:$0xff]  ;;  %130 = vmatprep.mubr.msk.f32.mxu0 %vm142_vm1, %v141_v0  ;;  %vm99_vm2 = vcmask 64512  }
   0x2   :  { %v16_v2 = vld [vmem:[%s181_s2] sm:$0xff]  ;;  %129 = vmatpush3.xpose.msk.msra.mxu0 %vm22_vm0, %v15_v1  ;;  %136 = vset.pattern.permute.xlu0 %v143_v4 }
   0x3   :  { %v14_v3 = vld [vmem:[%s180_s1] sm:$0xff]  ;;  %19 = vperm.xlu0 %136, %v16_v2  }
   0x5   :  { %131 = vmatmul.mubr.msk.f32.vlgmr.msra.gmra.mrb[0].mxu0 %vm22_vm0, %v14_v3 }
  0x82   :  { %v20_v5 = vpop.permute.xlu0 %19 }
  0xd8   :  { %v95_v6 = vpop.f32.mrb[0].mxu0 }
  0xd9   :  { %v96_v7 = vadd.f32 %v95_v6, %v20_v5  ;;  %v132_v8 = vpop.f32.mrb[1].mxu0 }
  0xdb   :  { %v100_v9 = vsel %vm99_vm2, %v96_v7, -inf }
  0xdc   :  { %v101_v10 = vrot.slane %v100_v9, 4 }
  0xde   :  { %v102_v11 = vmax.f32 %v100_v9, %v101_v10 }
  0xe0   :  { %v103_v12 = vrot.slane %v102_v11, 2 }
  0xe2   :  { %v104_v13 = vmax.f32 %v102_v11, %v103_v12 }
  0xe4   :  { %v105_v14 = vrot.slane %v104_v13, 1 }
  0xe6   :  { %v106_v15 = vmax.f32 %v104_v13, %v105_v14 }
  0xe8   :  { %v107_v16 = vsub.f32 %v96_v7, %v106_v15 }
  0xea   :  { %v108_v17 = vmul.f32 1.442695, %v107_v16 }
  0xec   :  { %137 = vpow2.f32 %v108_v17 }
  0xf6   :  { %v138_v18 = vpop.eup %137 }
  0xf7   :  { %v110_v19 = vsel %vm99_vm2, %v138_v18, 0.0 }
  0xf8   :  { %v111_v20 = vrot.slane %v110_v19, 4 }
  0xfa   :  { %v112_v21 = vadd.f32 %v111_v20, %v110_v19 }
  0xfc   :  { %v113_v22 = vrot.slane %v112_v21, 2 }
  0xfe   :  { %v114_v23 = vadd.f32 %v113_v22, %v112_v21 }
 0x100   :  { %v115_v24 = vrot.slane %v114_v23, 1 }
 0x102   :  { %v116_v25 = vadd.f32 %v115_v24, %v114_v23 }
 0x104   :  { %139 = vrcp.f32 %v116_v25 }
 0x10e   :  { %v140_v26 = vpop.eup %139 }
 0x10f   :  { %v118_v27 = vmul.f32 %v140_v26, %v138_v18 }
 0x111   :  { %119 = vst.msk [vmem:[%s182_s3] sm:$0xff] %vm99_vm2, %v118_v27 }

</bundles_post_ra>
